<compile_context>
chip_gen: v6e
topology: v6e:2x2x1
jax: 0.10.0
libtpu: 0.0.40
codegen_flags: <defaults>
</compile_context>

<pallas_src>
import functools
import math

import jax
import jax.numpy as jnp
from jax import lax
from jax.experimental import pallas as pl
from jax.experimental.pallas import tpu as pltpu


def _round_up(x: int, m: int) -> int:
    return ((x + m - 1) // m) * m


def _moe_gate_kernel(x_ref, wt_ref, out_ref, *, top_k: int, n_experts: int,
                     norm_topk_prob: bool):
    # x_ref: (tm, H) activations (native dtype -> MXU, f32 accumulate)
    # wt_ref: (H, E_pad) pre-transposed, lane-padded gate weight
    # out_ref: (tm, out_lanes) f32 packed output slab
    logits = jnp.dot(x_ref[...], wt_ref[...],
                     preferred_element_type=jnp.float32)        # (tm, E_pad) f32
    tm, e_pad = logits.shape
    out_lanes = out_ref.shape[-1]

    col = lax.broadcasted_iota(jnp.int32, (tm, e_pad), 1)
    if e_pad != n_experts:
        # Padded expert columns must never win top-k.
        logits = jnp.where(col < n_experts, logits, -jnp.inf)

    renorm = (top_k > 1) and norm_topk_prob

    # Iterative top-k on the raw logits (softmax is monotone, so selection and
    # first-occurrence tie-break match torch.topk / lax.top_k on the scores).
    vals, idxs = [], []
    work = logits
    for k in range(top_k):
        v = jnp.max(work, axis=-1, keepdims=True)                        # (tm,1)
        i = jnp.min(jnp.where(work == v, col, e_pad),
                    axis=-1, keepdims=True).astype(jnp.int32)            # (tm,1)
        vals.append(v)
        idxs.append(i)
        if k + 1 < top_k:
            work = jnp.where(col == i, -jnp.inf, work)

    m = vals[0]                                   # per-row max logit (top-1)
    exp_vals = [jnp.exp(v - m) for v in vals]     # exp only the K winners

    if renorm:
        # Renormalized top-k probs: the global softmax denominator cancels, so
        # only K transcendentals per row are needed (not E).
        denom = exp_vals[0]
        for ev in exp_vals[1:]:
            denom = denom + ev
        inv = pl.reciprocal(denom + 1e-20, approx=False)
    else:
        # True softmax probabilities: full-row exp for the denominator only,
        # then per-row reciprocal + broadcast multiply (no (tm, E) divide).
        z = jnp.sum(jnp.exp(logits - m), axis=-1, keepdims=True)
        inv = pl.reciprocal(z, approx=False)

    # Build the lane-dense packed slab in registers and store once:
    # lanes [0, K) = weights, lanes [K, 2K) = indices as exact f32 integers.
    ocol = lax.broadcasted_iota(jnp.int32, (tm, out_lanes), 1)
    slab = jnp.zeros((tm, out_lanes), jnp.float32)
    for k in range(top_k):
        slab = jnp.where(ocol == k, exp_vals[k] * inv, slab)
        slab = jnp.where(ocol == top_k + k, idxs[k].astype(jnp.float32), slab)
    out_ref[...] = slab


def _select_token_tile(T, h, itemsize, e_pad, out_lanes, block_tokens, vmem_cap):
    """Pick the token tile: dtype-native sublane multiple, >=2 grid steps when
    possible (v7x megacore), capped by a generation-aware VMEM budget."""
    sub = {4: 8, 2: 16, 1: 32}.get(itemsize, 8)
    tm = max(sub, min(_round_up(block_tokens, sub), _round_up(T, sub)))

    # Keep at least 2 grid steps so both v7x TensorCores get work and the
    # token-tile pipeline has something to overlap.
    while tm > sub and pl.cdiv(T, tm) < 2:
        tm = max(sub, _round_up(tm // 2, sub))

    budget = int(0.75 * vmem_cap)

    def est(tm_):
        return (2 * tm_ * h * itemsize          # double-buffered x tiles
                + h * e_pad * itemsize          # resident (single-buffered) weight
                + 2 * tm_ * out_lanes * 4       # double-buffered output slab
                + 4 * tm_ * e_pad * 4)          # logits / exp / iota temporaries

    while tm > sub and est(tm) > budget:
        tm = max(sub, _round_up(tm // 2, sub))

    return tm, est(tm), budget


def moe_gate_forward(hidden_states, weight, *, top_k: int,
                     norm_topk_prob: bool = True, block_tokens: int = 1024):
    """Pallas implementation of MoEGate.forward (eval mode).

    Returns (topk_idx [T,K] int32, topk_weight [T,K] f32, aux_loss=0.0)
    with T = bsz*seq_len, matching the PyTorch module's flattened-token output.
    """
    bsz, seq_len, h = hidden_states.shape
    n_experts = weight.shape[0]
    assert n_experts < (1 << 24)  # indices carried as exact f32 integers
    T = bsz * seq_len
    x = hidden_states.reshape(T, h)

    # Feed the MXU the activations' native dtype (bf16 stays bf16, f32 acc).
    if weight.dtype != x.dtype:
        weight = weight.astype(x.dtype)

    # One-time weight prep: transpose to (H, E) and lane-pad E so the MXU RHS is
    # already in (k, n) order and the logits block is lane-dense.
    e_pad = _round_up(max(n_experts, 128), 128)
    wt = weight.T
    if e_pad != n_experts:
        wt = jnp.pad(wt, ((0, 0), (0, e_pad - n_experts)))

    out_lanes = _round_up(max(2 * top_k, 128), 128)
    itemsize = jnp.dtype(x.dtype).itemsize

    try:
        vmem_cap = int(pltpu.get_tpu_info().vmem_capacity_bytes)
    except Exception:
        vmem_cap = 64 << 20          # conservative: v7x per-TensorCore VMEM

    tm, vmem_est, vmem_budget = _select_token_tile(
        T, h, itemsize, e_pad, out_lanes, block_tokens, vmem_cap)
    num_blocks = pl.cdiv(T, tm)      # ragged last tile handled by Pallas masking

    renorm = (top_k > 1) and norm_topk_prob
    cost = pl.CostEstimate(
        flops=2 * T * h * e_pad,
        transcendentals=T * (top_k if renorm else e_pad),
        bytes_accessed=(T * h * itemsize + h * e_pad * itemsize
                        + T * out_lanes * 4))

    cp_kwargs = dict(dimension_semantics=("parallel",))   # tokens independent
    if vmem_est > (12 << 20):
        cp_kwargs["vmem_limit_bytes"] = int(
            min(max(2 * vmem_est, 32 << 20), vmem_budget))
    compiler_params = pltpu.CompilerParams(**cp_kwargs)

    kernel = functools.partial(
        _moe_gate_kernel, top_k=top_k, n_experts=n_experts,
        norm_topk_prob=norm_topk_prob)

    def call(weight_spec):
        return pl.pallas_call(
            kernel,
            out_shape=jax.ShapeDtypeStruct((T, out_lanes), jnp.float32),
            grid=(num_blocks,),
            in_specs=[
                pl.BlockSpec((tm, h), lambda i: (i, 0)),   # streamed x tile
                weight_spec,                               # resident gate weight
            ],
            out_specs=pl.BlockSpec((tm, out_lanes), lambda i: (i, 0)),
            compiler_params=compiler_params,
            cost_estimate=cost,
        )(x, wt)

    try:
        # Grid-invariant weight: single-buffer it (double buffering only wastes VMEM).
        packed = call(pl.BlockSpec((h, e_pad), lambda i: (0, 0),
                                   pipeline_mode=pl.Buffered(1)))
    except Exception:
        packed = call(pl.BlockSpec((h, e_pad), lambda i: (0, 0)))

    topk_weight = packed[:, :top_k]
    topk_idx = packed[:, top_k:2 * top_k].astype(jnp.int32)  # exact (< 2^24)

    aux_loss = 0.0  # eval mode (self.training == False)
    return topk_idx, topk_weight, aux_loss


def _reference(hidden_states, weight, top_k, norm_topk_prob):
    x = hidden_states.reshape(-1, hidden_states.shape[-1]).astype(jnp.float32)
    logits = jnp.dot(x, weight.astype(jnp.float32).T,
                     precision=lax.Precision.HIGHEST)
    scores = jax.nn.softmax(logits, axis=-1)
    vals, idx = lax.top_k(scores, top_k)
    if top_k > 1 and norm_topk_prob:
        vals = vals / (jnp.sum(vals, axis=-1, keepdims=True) + 1e-20)
    return idx, vals


if __name__ == "__main__":
    # Small config consistent with MiniMindConfig defaults (scaled-down hidden).
    bsz, seq_len, hidden_size = 2, 8, 32
    n_routed_experts, num_experts_per_tok = 4, 2

    key = jax.random.PRNGKey(0)
    k_x, k_w = jax.random.split(key)

    # Round inputs to bf16-representable values so MXU products are exact and the
    # comparison against the f32 reference is independent of matmul precision mode.
    hidden_states = jax.random.normal(
        k_x, (bsz, seq_len, hidden_size), dtype=jnp.float32)
    hidden_states = hidden_states.astype(jnp.bfloat16).astype(jnp.float32)

    # kaiming_uniform_(a=sqrt(5)) over weight (E, H): bound = 1/sqrt(fan_in)
    bound = 1.0 / math.sqrt(hidden_size)
    weight = jax.random.uniform(
        k_w, (n_routed_experts, hidden_size),
        minval=-bound, maxval=bound, dtype=jnp.float32)
    weight = weight.astype(jnp.bfloat16).astype(jnp.float32)

    cases = [
        dict(norm_topk_prob=True, block_tokens=1024, dtype=jnp.float32),
        dict(norm_topk_prob=True, block_tokens=8, dtype=jnp.float32),    # multi-tile
        dict(norm_topk_prob=False, block_tokens=1024, dtype=jnp.float32),  # full softmax
        dict(norm_topk_prob=True, block_tokens=1024, dtype=jnp.bfloat16),  # bf16 tile path
    ]
    for case in cases:
        hs = hidden_states.astype(case["dtype"])
        topk_idx, topk_weight, aux_loss = moe_gate_forward(
            hs, weight, top_k=num_experts_per_tok,
            norm_topk_prob=case["norm_topk_prob"],
            block_tokens=case["block_tokens"])
        jax.block_until_ready((topk_idx, topk_weight))

        ref_idx, ref_w = _reference(
            hs, weight, num_experts_per_tok, case["norm_topk_prob"])

        assert topk_idx.shape == (bsz * seq_len, num_experts_per_tok), case
        assert topk_weight.shape == (bsz * seq_len, num_experts_per_tok), case
        assert jnp.all(topk_idx == ref_idx), case
        assert jnp.allclose(topk_weight, ref_w, atol=1e-5, rtol=1e-5), case
        assert aux_loss == 0.0, case

    # Ragged token count (exercises the partial-last-tile path, no jnp.pad copy):
    hs2 = jax.random.normal(
        jax.random.PRNGKey(1), (1, 5, hidden_size), dtype=jnp.float32)
    hs2 = hs2.astype(jnp.bfloat16).astype(jnp.float32)
    idx2, w2, _ = moe_gate_forward(
        hs2, weight, top_k=num_experts_per_tok, norm_topk_prob=True)
    jax.block_until_ready((idx2, w2))
    ref_idx2, ref_w2 = _reference(hs2, weight, num_experts_per_tok, True)
    assert idx2.shape == (5, num_experts_per_tok)
    assert jnp.all(idx2 == ref_idx2)
    assert jnp.allclose(w2, ref_w2, atol=1e-5, rtol=1e-5)

    print("KERNEL_OK")
</pallas_src>

<mosaic_0001>
module attributes {stable_mosaic.version = 11 : i64} {
  func.func @_moe_gate_kernel(%arg0: i32, %arg1: memref<8x32xf32, #tpu.memory_space<vmem>>, %arg2: memref<32x128xf32, #tpu.memory_space<vmem>>, %arg3: memref<8x128xf32, #tpu.memory_space<vmem>>) attributes {dimension_semantics = [#tpu.dimension_semantics<parallel>], iteration_bounds = array<i64: 2>, scalar_prefetch = 0 : i64, scratch_operands = 0 : i64, tpu.core_type = #tpu.core_type<tc>, window_params = [{transform_indices = @transform_0, window_bounds = array<i64: 8, 32>}, {pipeline_mode = #tpu.pipeline_mode<synchronous>, transform_indices = @transform_1, window_bounds = array<i64: 32, 128>}, {transform_indices = @transform_2, window_bounds = array<i64: 8, 128>}]} {
    %c0 = arith.constant 0 : index
    %c0_0 = arith.constant 0 : index
    %0 = vector.load %arg1[%c0, %c0_0] : memref<8x32xf32, #tpu.memory_space<vmem>>, vector<8x32xf32>
    %c0_1 = arith.constant 0 : index
    %c0_2 = arith.constant 0 : index
    %1 = vector.load %arg2[%c0_1, %c0_2] : memref<32x128xf32, #tpu.memory_space<vmem>>, vector<32x128xf32>
    %cst = arith.constant dense<0.000000e+00> : vector<8x128xf32>
    %2 = tpu.matmul %0, %1, %cst {dimension_numbers = #tpu.dot_dimension_numbers<[1], [0], [0], [1], [0, 0, 1, 1], [], []>} : vector<8x32xf32>, vector<32x128xf32>, vector<8x128xf32> -> vector<8x128xf32>
    %3 = tpu.iota {dimensions = array<i32: 1>} : vector<8x128xi32>
    %c4_i32 = arith.constant 4 : i32
    %4 = vector.broadcast %c4_i32 : i32 to vector<8x128xi32>
    %5 = arith.cmpi slt, %3, %4 : vector<8x128xi32>
    %cst_3 = arith.constant 0xFF800000 : f32
    %6 = vector.broadcast %cst_3 : f32 to vector<8x128xf32>
    %7 = arith.select %5, %2, %6 : vector<8x128xi1>, vector<8x128xf32>
    %cst_4 = arith.constant dense<0xFF800000> : vector<8xf32>
    %8 = vector.multi_reduction <maximumf>, %7, %cst_4 [1] : vector<8x128xf32> to vector<8xf32>
    %9 = vector.shape_cast %8 : vector<8xf32> to vector<8x1xf32>
    %10 = vector.broadcast %9 : vector<8x1xf32> to vector<8x128xf32>
    %11 = arith.cmpf oeq, %7, %10 : vector<8x128xf32>
    %c128_i32 = arith.constant 128 : i32
    %12 = vector.broadcast %c128_i32 : i32 to vector<8x128xi32>
    %13 = arith.select %11, %3, %12 : vector<8x128xi1>, vector<8x128xi32>
    %cst_5 = arith.constant dense<2147483647> : vector<8xi32>
    %14 = vector.multi_reduction <minsi>, %13, %cst_5 [1] : vector<8x128xi32> to vector<8xi32>
    %15 = vector.shape_cast %14 : vector<8xi32> to vector<8x1xi32>
    %16 = vector.broadcast %15 : vector<8x1xi32> to vector<8x128xi32>
    %17 = arith.cmpi eq, %3, %16 : vector<8x128xi32>
    %cst_6 = arith.constant 0xFF800000 : f32
    %18 = vector.broadcast %cst_6 : f32 to vector<8x128xf32>
    %19 = arith.select %17, %18, %7 : vector<8x128xi1>, vector<8x128xf32>
    %cst_7 = arith.constant dense<0xFF800000> : vector<8xf32>
    %20 = vector.multi_reduction <maximumf>, %19, %cst_7 [1] : vector<8x128xf32> to vector<8xf32>
    %21 = vector.shape_cast %20 : vector<8xf32> to vector<8x1xf32>
    %22 = vector.broadcast %21 : vector<8x1xf32> to vector<8x128xf32>
    %23 = arith.cmpf oeq, %19, %22 : vector<8x128xf32>
    %c128_i32_8 = arith.constant 128 : i32
    %24 = vector.broadcast %c128_i32_8 : i32 to vector<8x128xi32>
    %25 = arith.select %23, %3, %24 : vector<8x128xi1>, vector<8x128xi32>
    %cst_9 = arith.constant dense<2147483647> : vector<8xi32>
    %26 = vector.multi_reduction <minsi>, %25, %cst_9 [1] : vector<8x128xi32> to vector<8xi32>
    %27 = vector.shape_cast %26 : vector<8xi32> to vector<8x1xi32>
    %28 = arith.subf %9, %9 : vector<8x1xf32>
    %29 = math.exp %28 : vector<8x1xf32>
    %30 = arith.subf %21, %9 : vector<8x1xf32>
    %31 = math.exp %30 : vector<8x1xf32>
    %32 = arith.addf %29, %31 : vector<8x1xf32>
    %cst_10 = arith.constant 9.99999968E-21 : f32
    %33 = vector.broadcast %cst_10 : f32 to vector<8x1xf32>
    %34 = arith.addf %32, %33 : vector<8x1xf32>
    %35 = tpu.reciprocal %34 : vector<8x1xf32> -> vector<8x1xf32>
    %36 = tpu.iota {dimensions = array<i32: 1>} : vector<8x128xi32>
    %cst_11 = arith.constant 0.000000e+00 : f32
    %37 = vector.broadcast %cst_11 : f32 to vector<8x128xf32>
    %c0_i32 = arith.constant 0 : i32
    %38 = vector.broadcast %c0_i32 : i32 to vector<8x128xi32>
    %39 = arith.cmpi eq, %36, %38 : vector<8x128xi32>
    %40 = arith.mulf %29, %35 : vector<8x1xf32>
    %41 = vector.shape_cast %40 : vector<8x1xf32> to vector<8x1xf32>
    %42 = vector.broadcast %41 : vector<8x1xf32> to vector<8x128xf32>
    %43 = arith.select %39, %42, %37 : vector<8x128xi1>, vector<8x128xf32>
    %c2_i32 = arith.constant 2 : i32
    %44 = vector.broadcast %c2_i32 : i32 to vector<8x128xi32>
    %45 = arith.cmpi eq, %36, %44 : vector<8x128xi32>
    %46 = arith.sitofp %15 : vector<8x1xi32> to vector<8x1xf32>
    %47 = vector.shape_cast %46 : vector<8x1xf32> to vector<8x1xf32>
    %48 = vector.broadcast %47 : vector<8x1xf32> to vector<8x128xf32>
    %49 = arith.select %45, %48, %43 : vector<8x128xi1>, vector<8x128xf32>
    %c1_i32 = arith.constant 1 : i32
    %50 = vector.broadcast %c1_i32 : i32 to vector<8x128xi32>
    %51 = arith.cmpi eq, %36, %50 : vector<8x128xi32>
    %52 = arith.mulf %31, %35 : vector<8x1xf32>
    %53 = vector.shape_cast %52 : vector<8x1xf32> to vector<8x1xf32>
    %54 = vector.broadcast %53 : vector<8x1xf32> to vector<8x128xf32>
    %55 = arith.select %51, %54, %49 : vector<8x128xi1>, vector<8x128xf32>
    %c3_i32 = arith.constant 3 : i32
    %56 = vector.broadcast %c3_i32 : i32 to vector<8x128xi32>
    %57 = arith.cmpi eq, %36, %56 : vector<8x128xi32>
    %58 = arith.sitofp %27 : vector<8x1xi32> to vector<8x1xf32>
    %59 = vector.shape_cast %58 : vector<8x1xf32> to vector<8x1xf32>
    %60 = vector.broadcast %59 : vector<8x1xf32> to vector<8x128xf32>
    %61 = arith.select %57, %60, %55 : vector<8x128xi1>, vector<8x128xf32>
    %c0_12 = arith.constant 0 : index
    %c0_13 = arith.constant 0 : index
    %62 = vector.load %arg3[%c0_12, %c0_13] : memref<8x128xf32, #tpu.memory_space<vmem>>, vector<8x128xf32>
    tpu.vector_store %arg3[%c0_12, %c0_13], %61 {strides = array<i32>} : memref<8x128xf32, #tpu.memory_space<vmem>>, vector<8x128xf32>,
    return
  }
  func.func @transform_0(%arg0: i32) -> (i32, i32) {
    %c0_i32 = arith.constant 0 : i32
    %c0_i32_0 = arith.constant 0 : i32
    return %arg0, %c0_i32 : i32, i32
  }
  func.func @transform_1(%arg0: i32) -> (i32, i32) {
    %c0_i32 = arith.constant 0 : i32
    %c0_i32_0 = arith.constant 0 : i32
    %c0_i32_1 = arith.constant 0 : i32
    return %c0_i32, %c0_i32_0 : i32, i32
  }
  func.func @transform_2(%arg0: i32) -> (i32, i32) {
    %c0_i32 = arith.constant 0 : i32
    %c0_i32_0 = arith.constant 0 : i32
    return %arg0, %c0_i32 : i32, i32
  }
}

module attributes {stable_mosaic.version = 11 : i64} {
  func.func @_moe_gate_kernel(%arg0: i32, %arg1: memref<8x32xf32, #tpu.memory_space<vmem>>, %arg2: memref<32x128xf32, #tpu.memory_space<vmem>>, %arg3: memref<8x128xf32, #tpu.memory_space<vmem>>) attributes {dimension_semantics = [#tpu.dimension_semantics<parallel>], iteration_bounds = array<i64: 2>, scalar_prefetch = 0 : i64, scratch_operands = 0 : i64, tpu.core_type = #tpu.core_type<tc>, window_params = [{transform_indices = @transform_0, window_bounds = array<i64: 8, 32>}, {pipeline_mode = #tpu.pipeline_mode<synchronous>, transform_indices = @transform_1, window_bounds = array<i64: 32, 128>}, {transform_indices = @transform_2, window_bounds = array<i64: 8, 128>}]} {
    %c0 = arith.constant 0 : index
    %c0_0 = arith.constant 0 : index
    %0 = vector.load %arg1[%c0, %c0_0] : memref<8x32xf32, #tpu.memory_space<vmem>>, vector<8x32xf32>
    %c0_1 = arith.constant 0 : index
    %c0_2 = arith.constant 0 : index
    %1 = vector.load %arg2[%c0_1, %c0_2] : memref<32x128xf32, #tpu.memory_space<vmem>>, vector<32x128xf32>
    %cst = arith.constant dense<0.000000e+00> : vector<8x128xf32>
    %2 = tpu.matmul %0, %1, %cst {dimension_numbers = #tpu.dot_dimension_numbers<[1], [0], [0], [1], [0, 0, 1, 1], [], []>} : vector<8x32xf32>, vector<32x128xf32>, vector<8x128xf32> -> vector<8x128xf32>
    %3 = tpu.iota {dimensions = array<i32: 1>} : vector<8x128xi32>
    %c4_i32 = arith.constant 4 : i32
    %4 = vector.broadcast %c4_i32 : i32 to vector<8x128xi32>
    %5 = arith.cmpi slt, %3, %4 : vector<8x128xi32>
    %cst_3 = arith.constant 0xFF800000 : f32
    %6 = vector.broadcast %cst_3 : f32 to vector<8x128xf32>
    %7 = arith.select %5, %2, %6 : vector<8x128xi1>, vector<8x128xf32>
    %cst_4 = arith.constant dense<0xFF800000> : vector<8xf32>
    %8 = vector.multi_reduction <maximumf>, %7, %cst_4 [1] : vector<8x128xf32> to vector<8xf32>
    %9 = vector.shape_cast %8 : vector<8xf32> to vector<8x1xf32>
    %10 = vector.broadcast %9 : vector<8x1xf32> to vector<8x128xf32>
    %11 = arith.cmpf oeq, %7, %10 : vector<8x128xf32>
    %c128_i32 = arith.constant 128 : i32
    %12 = vector.broadcast %c128_i32 : i32 to vector<8x128xi32>
    %13 = arith.select %11, %3, %12 : vector<8x128xi1>, vector<8x128xi32>
    %cst_5 = arith.constant dense<2147483647> : vector<8xi32>
    %14 = vector.multi_reduction <minsi>, %13, %cst_5 [1] : vector<8x128xi32> to vector<8xi32>
    %15 = vector.shape_cast %14 : vector<8xi32> to vector<8x1xi32>
    %16 = vector.broadcast %15 : vector<8x1xi32> to vector<8x128xi32>
    %17 = arith.cmpi eq, %3, %16 : vector<8x128xi32>
    %cst_6 = arith.constant 0xFF800000 : f32
    %18 = vector.broadcast %cst_6 : f32 to vector<8x128xf32>
    %19 = arith.select %17, %18, %7 : vector<8x128xi1>, vector<8x128xf32>
    %cst_7 = arith.constant dense<0xFF800000> : vector<8xf32>
    %20 = vector.multi_reduction <maximumf>, %19, %cst_7 [1] : vector<8x128xf32> to vector<8xf32>
    %21 = vector.shape_cast %20 : vector<8xf32> to vector<8x1xf32>
    %22 = vector.broadcast %21 : vector<8x1xf32> to vector<8x128xf32>
    %23 = arith.cmpf oeq, %19, %22 : vector<8x128xf32>
    %c128_i32_8 = arith.constant 128 : i32
    %24 = vector.broadcast %c128_i32_8 : i32 to vector<8x128xi32>
    %25 = arith.select %23, %3, %24 : vector<8x128xi1>, vector<8x128xi32>
    %cst_9 = arith.constant dense<2147483647> : vector<8xi32>
    %26 = vector.multi_reduction <minsi>, %25, %cst_9 [1] : vector<8x128xi32> to vector<8xi32>
    %27 = vector.shape_cast %26 : vector<8xi32> to vector<8x1xi32>
    %28 = arith.subf %9, %9 : vector<8x1xf32>
    %29 = math.exp %28 : vector<8x1xf32>
    %30 = arith.subf %21, %9 : vector<8x1xf32>
    %31 = math.exp %30 : vector<8x1xf32>
    %32 = arith.addf %29, %31 : vector<8x1xf32>
    %cst_10 = arith.constant 9.99999968E-21 : f32
    %33 = vector.broadcast %cst_10 : f32 to vector<8x1xf32>
    %34 = arith.addf %32, %33 : vector<8x1xf32>
    %35 = tpu.reciprocal %34 : vector<8x1xf32> -> vector<8x1xf32>
    %36 = tpu.iota {dimensions = array<i32: 1>} : vector<8x128xi32>
    %cst_11 = arith.constant 0.000000e+00 : f32
    %37 = vector.broadcast %cst_11 : f32 to vector<8x128xf32>
    %c0_i32 = arith.constant 0 : i32
    %38 = vector.broadcast %c0_i32 : i32 to vector<8x128xi32>
    %39 = arith.cmpi eq, %36, %38 : vector<8x128xi32>
    %40 = arith.mulf %29, %35 : vector<8x1xf32>
    %41 = vector.shape_cast %40 : vector<8x1xf32> to vector<8x1xf32>
    %42 = vector.broadcast %41 : vector<8x1xf32> to vector<8x128xf32>
    %43 = arith.select %39, %42, %37 : vector<8x128xi1>, vector<8x128xf32>
    %c2_i32 = arith.constant 2 : i32
    %44 = vector.broadcast %c2_i32 : i32 to vector<8x128xi32>
    %45 = arith.cmpi eq, %36, %44 : vector<8x128xi32>
    %46 = arith.sitofp %15 : vector<8x1xi32> to vector<8x1xf32>
    %47 = vector.shape_cast %46 : vector<8x1xf32> to vector<8x1xf32>
    %48 = vector.broadcast %47 : vector<8x1xf32> to vector<8x128xf32>
    %49 = arith.select %45, %48, %43 : vector<8x128xi1>, vector<8x128xf32>
    %c1_i32 = arith.constant 1 : i32
    %50 = vector.broadcast %c1_i32 : i32 to vector<8x128xi32>
    %51 = arith.cmpi eq, %36, %50 : vector<8x128xi32>
    %52 = arith.mulf %31, %35 : vector<8x1xf32>
    %53 = vector.shape_cast %52 : vector<8x1xf32> to vector<8x1xf32>
    %54 = vector.broadcast %53 : vector<8x1xf32> to vector<8x128xf32>
    %55 = arith.select %51, %54, %49 : vector<8x128xi1>, vector<8x128xf32>
    %c3_i32 = arith.constant 3 : i32
    %56 = vector.broadcast %c3_i32 : i32 to vector<8x128xi32>
    %57 = arith.cmpi eq, %36, %56 : vector<8x128xi32>
    %58 = arith.sitofp %27 : vector<8x1xi32> to vector<8x1xf32>
    %59 = vector.shape_cast %58 : vector<8x1xf32> to vector<8x1xf32>
    %60 = vector.broadcast %59 : vector<8x1xf32> to vector<8x128xf32>
    %61 = arith.select %57, %60, %55 : vector<8x128xi1>, vector<8x128xf32>
    %c0_12 = arith.constant 0 : index
    %c0_13 = arith.constant 0 : index
    %62 = vector.load %arg3[%c0_12, %c0_13] : memref<8x128xf32, #tpu.memory_space<vmem>>, vector<8x128xf32>
    tpu.vector_store %arg3[%c0_12, %c0_13], %61 {strides = array<i32>} : memref<8x128xf32, #tpu.memory_space<vmem>>, vector<8x128xf32>,
    return
  }
  func.func @transform_0(%arg0: i32) -> (i32, i32) {
    %c0_i32 = arith.constant 0 : i32
    %c0_i32_0 = arith.constant 0 : i32
    return %arg0, %c0_i32 : i32, i32
  }
  func.func @transform_1(%arg0: i32) -> (i32, i32) {
    %c0_i32 = arith.constant 0 : i32
    %c0_i32_0 = arith.constant 0 : i32
    %c0_i32_1 = arith.constant 0 : i32
    return %c0_i32, %c0_i32_0 : i32, i32
  }
  func.func @transform_2(%arg0: i32) -> (i32, i32) {
    %c0_i32 = arith.constant 0 : i32
    %c0_i32_0 = arith.constant 0 : i32
    return %arg0, %c0_i32 : i32, i32
  }
}

</mosaic_0001>

<bundles_post_ra>
// kernel: tpu_custom_call.1
= control target key start
LH: loop header
LB: loop body
LE: loop exit
PB: predicated region body
PF: predicated region fallthrough
CT: control target
= control target key end

     0   :  { %7 = vsyncpa [#allocation3], 0  ;;  %s829_s0 = inlined_call_operand.hbm [shape: f32[16,32], index: 0, kind: input, shape index: {}]   ;;  %s830_s1 = inlined_call_operand.hbm [shape: f32[32,128], index: 1, kind: input, shape index: {}]   ;;  %s831_s2 = inlined_call_operand.hbm [shape: f32[16,128], index: 2, kind: output, shape index: {}]  }
   0x1   :  { %9 = vsyncpa [#allocation3 + $0x1], 0 }
   0x2   :  { %10 = vsyncpa [#allocation6], 0 }
   0x3   :  { %11 = vsyncpa [#allocation4], 0 }
   0x4   :  { %13 = vsyncpa [#allocation4 + $0x1], 0  ;;  %s655_s9 = smov 0   ;;  %s657_s10 = smov 0  }
   0x5   :  { %s659_s11 = smov 0   ;;  %s661_s12 = smov 0  }
   0x6 LB: > { %s676_s13 = sadd.s32 4294967295, %s631_s12   ;;  %s411_s14 = sadd.s32 4294967294, %s631_s12   ;;  %s631_s12 = sphi %s661_s12, %s853_s12   ;;  %s627_s11 = sphi %s659_s11, %s852_s11   ;;  %s623_s10 = sphi %s657_s10, %s851_s10   ;;  %s619_s9 = sphi %s655_s9, %s850_s9  }
   0x7   : > { %p39_p0 = scmp.ne.s32.totalorder %s623_s10, %s619_s9  ;;  %p832_p1 = scmp.eq.s32.totalorder %s676_s13, 0 }
   0x8   : > { %p90_p3 = scmp.eq.s32.totalorder %s411_s14, 1  ;;  %p412_p5 = scmp.ge.s32.totalorder %s631_s12, 1 }
   0x9   : > { %p685_p4 = por %p832_p1, %p39_p0  ;;  %p97_p7 = scmp.lt.s32.totalorder %s631_s12, 3 }
   0xa   : > { %p690_p6 = por %p90_p3, %p39_p0  ;;  %s633_s18 = smov [#allocation5]  }
   0xb   : > { %s836_s15 = scalar_select %p685_p4, 1, 0 }
   0xc   : > { %s837_s16 = scalar_select %p690_p6, 1, 0 }
   0xd   : > { %p695_p8 = pnand %p412_p5, %p97_p7  ;;  %s109_s19 = sshll.u32 %s633_s18, 4  ;;  %s110_s19 = int_to_ptr.vmem [resolvable:$true] %s109_s19 }
   0xe   : > { %s709_s21 = sadd.s32 1, %s631_s12   ;;  %s26_s22 = sadd.s32 1, %s627_s11 }
   0xf   : > { %s838_s17 = scalar_select %p695_p8, 1, 0 }
  0x10   : > { %p450_p9 = pneg %p695_p8  ;;  %s23_s23 = ssub.s32 %s631_s12, %s709_s21 }
  0x11   : > { %s520_s24 = scalar_lea.vmem %s110_s19, 512  ;;  %p528_p5 = scmp.lt.s32.totalorder %s110_s19, %s110_s19 }
  0x12   : > { %p704_p11 = pnand %p450_p9, %p832_p1  ;;  %p521_p13 = scmp.ne.s32.totalorder %s110_s19, %s520_s24 }
  0x13   : > { %p529_p7 = scmp.lt.s32.totalorder %s520_s24, %s520_s24 }
  0x14   : > { %p511_p12 = pneg %p704_p11 }
  0x15   : > { %p530_p10 = por %p529_p7, %p528_p5 }
  0x16   : > { %p523_p0 = pnand %p521_p13, %p511_p12 }
  0x18   : > { %p524_p3 = pneg %p523_p0 }
  0x1a   : > { %p531_p2 = pnand %p530_p10, %p524_p3 }
  0x1c   : > { %534 = shalt.err (!%p531_p2)
}
  0x1d   : > { %s634_s25 = smov 128   ;;  %s635_s26 = smov 8  }
  0x1e   : > { %453 = dma.hbm_to_vmem [thread:$0]  (!%p704_p11), %s830_s1, 512, %s110_s19, [#allocation6], %s634_s25, %s634_s25, %s635_s26  }
  0x1f   : > { %p24_p9 = scmp.eq.s32.totalorder %s23_s23, 0  ;;  %p33_p12 = scmp.ne.s32.totalorder %s627_s11, %s623_s10 }
  0x20   : > { %p34_p10 = scmp.eq.s32.totalorder %s631_s12, 0  ;;  %p463_p2 = scmp.lt.s32.totalorder %s631_s12, 2 }
  0x21   : > { %s726_s29 = scalar_select %p24_p9, %s627_s11, %s26_s22  }
  0x22   : > { %p35_p13 = por %p34_p10, %p33_p12  ;;  %p840_p0 = scmp.eq.s32.totalorder %s676_s13, 1 }
  0x23   : > { %s123_s3 = sand.u32 1, %s627_s11   ;;  %s416_s4 = sshll.u32 %s631_s12, 7 }
  0x24   : > { %p730_p3 = por %p840_p0, %p33_p12  ;;  %s415_s5 = sshll.u32 %s123_s3, 3 }
  0x25   : > { %s739_s8 = scalar_lea.hbm %s829_s0, %s416_s4  ;;  %s127_s14 = scalar_lea.vmem [#allocation2], %s415_s5 }
  0x26   : > { %s841_s30 = scalar_select %p730_p3, 1, 0 }
  0x27   : > { %s134_s18 = sshll.u32 %s127_s14, 4  ;;  %p741_p11 = pnand %p463_p2, %p35_p13  ;;  %s135_s18 = int_to_ptr.vmem [resolvable:$true] %s134_s18 }
  0x28   : > { %s124_s20 = scalar_lea.sflag [#allocation3], %s123_s3  ;;  %s535_s22 = scalar_lea.hbm %s739_s8, 128 }
  0x29   : > { %p536_p5 = scmp.ne.s32.totalorder %s739_s8, %s535_s22  ;;  %p537_p7 = pneg %p741_p11 }
  0x2a   : > { %s540_s25 = scalar_lea.hbm %s829_s0, 256  ;;  %p541_p10 = scmp.lt.s32.totalorder %s739_s8, %s829_s0 }
  0x2b   : > { %p538_p9 = pnand %p537_p7, %p536_p5  ;;  %p542_p2 = scmp.lt.s32.totalorder %s540_s25, %s535_s22 }
  0x2d   : > { %p539_p12 = pneg %p538_p9  ;;  %p543_p13 = por %p542_p2, %p541_p10 }
  0x2f   : > { %p544_p0 = pnand %p543_p13, %p539_p12 }
  0x31   : > { %547 = shalt.err (!%p544_p0)
}
  0x32   : > { %s548_s28 = scalar_lea.vmem %s135_s18, 128  ;;  %s636_s3 = smov [#allocation2]  }
  0x33   : > { %p549_p1 = scmp.ne.s32.totalorder %s135_s18, %s548_s28  ;;  %s553_s4 = sshll.u32 %s636_s3, 4  ;;  %s554_s4 = int_to_ptr.vmem [resolvable:$false] %s553_s4 }
  0x34   : > { %s555_s5 = scalar_lea.vmem %s554_s4, 256  ;;  %p556_p5 = scmp.lt.s32.totalorder %s135_s18, %s554_s4 }
  0x35   : > { %p551_p6 = pnand %p549_p1, %p537_p7  ;;  %p557_p9 = scmp.lt.s32.totalorder %s555_s5, %s548_s28 }
  0x37   : > { %p552_p3 = pneg %p551_p6  ;;  %p558_p4 = por %p557_p9, %p556_p5 }
  0x39   : > { %p559_p8 = pnand %p558_p4, %p552_p3 }
  0x3b   : > { %562 = shalt.err (!%p559_p8)
}
  0x3c   : > { %457 = dma.hbm_to_vmem [thread:$0]  (!%p741_p11), %s739_s8, 128, %s135_s18, %s124_s20  }
  0x3d   : > { %p843_p12 = scmp.ne.s32.totalorder %s838_s17, 0 }
  0x3e   : > { %s762_s6 = sand.u32 (!%p843_p12), 1, %s623_s10   ;;  %p844_p1 = scmp.ne.s32.totalorder (!%p843_p12), %s836_s15, 0 }
  0x3f   : > { %143 = sbr.rel (%p843_p12) target bundleno = 1145 (0x479), region = 28  ;;  %s418_s7 = sshll.u32 (!%p843_p12), %s762_s6, 3 }
  0x40   : > { %s146_s14 = scalar_lea.sflag (!%p843_p12), [#allocation3], %s762_s6  ;;  %s149_s22 = scalar_lea.vmem (!%p843_p12), [#allocation2], %s418_s7 }
  0x44   : > { %606 = dma.done.wait (%p844_p1), %s146_s14, 128  }
  0x45   : > { %608 = vsyncadd (%p844_p1), %s146_s14, 4294967168  ;;  %p845_p4 = scmp.eq.s32.totalorder %s676_s13, 0 }
  0x47   : > { %610 = dma.done.wait (%p845_p4), [#allocation6], 512   ;;  %p846_p6 = pmov %p845_p4 }
  0x48   : > { %v637_v0 = vmov 0.0   ;;  %vm638_vm0 = vmmov 0   ;;  %v178_v1 = vld [vmem:[#allocation5 + $0x18] sm:$0xff]  ;;  %v177_v2 = vld [vmem:[#allocation5 + $0x10] sm:$0xff]  ;;  %v176_v3 = vld [vmem:[#allocation5 + $0x8] sm:$0xff]  ;;  %vm179_vm1 = vcmask 261120   ;;  %v253_v6 = vlaneseq }
  0x49   : > { %612 = vsyncadd (%p846_p6), [#allocation6], 4294966784  ;;  %431 = vmatprep.subr.mxu0 %v637_v0  ;;  %439 = vmatprep.mubr.msk.f32.mxu0 %vm638_vm0, %v637_v0  ;;  %v175_v4 = vld [vmem:[#allocation5] sm:$0xff]  ;;  %v174_v5 = vld [vmem:[%s149_s22] sm:$0xff]  ;;  %s423_s15 = sshll.u32 %s676_s13, 7  ;;  %s173_s17 = scalar_lea.vmem [#allocation7], %s418_s7 }
  0x4a   : > { %432 = vmatpush3.msra.mxu0 %v178_v1  ;;  %v776_v7 = vand.u32 127, %v253_v6  ;;  %s331_s8 = sshll.u32 %s173_s17, 4  ;;  %s792_s20 = scalar_lea.hbm %s831_s2, %s423_s15  ;;  %s332_s8 = int_to_ptr.vmem [resolvable:$true] %s331_s8 }
  0x4b   : > { %433 = vmatprep.subr.mxu0 %v637_v0  ;;  %s318_s23 = scalar_lea.sflag [#allocation4], %s762_s6  ;;  %s563_s24 = scalar_lea.vmem %s332_s8, 128 }
  0x4c   : > { %434 = vmatpush3.msra.mxu0 %v177_v2  ;;  %vm255_vm2 = vcmp.lt.s32.totalorder %v776_v7, 4  ;;  %vm304_vm8 = vcmp.eq.s32.totalorder %v776_v7, 0  ;;  %vm307_vm9 = vcmp.eq.s32.totalorder %v776_v7, 2  ;;  %vm310_vm10 = vcmp.eq.s32.totalorder %v776_v7, 1  ;;  %p564_p8 = scmp.ne.s32.totalorder %s332_s8, %s563_s24  ;;  %p847_p3 = scmp.ne.s32.totalorder %s841_s30, 0 }
  0x4d   : > { %435 = vmatprep.subr.mxu0 %v637_v0  ;;  %vm313_vm11 = vcmp.eq.s32.totalorder %v776_v7, 3  ;;  %s639_s13 = smov [#allocation7]  }
  0x4e   : > { %436 = vmatpush3.msra.mxu0 %v176_v3  ;;  %p565_p11 = pnand %p564_p8, %p847_p3  ;;  %s567_s25 = sshll.u32 %s639_s13, 4  ;;  %s568_s25 = int_to_ptr.vmem [resolvable:$false] %s567_s25 }
  0x4f   : > { %437 = vmatprep.subr.mxu0 %v637_v0  ;;  %s569_s26 = scalar_lea.vmem %s568_s25, 256  ;;  %p570_p10 = scmp.lt.s32.totalorder %s332_s8, %s568_s25 }
  0x50   : > { %438 = vmatpush3.msra.mxu0 %v175_v4  ;;  %p566_p7 = pneg %p565_p11  ;;  %p571_p2 = scmp.lt.s32.totalorder %s569_s26, %s563_s24 }
  0x51   : > { %440 = vmatmul.mubr.msk.f32.vlgmr.msra.gmra.mxu0 %vm179_vm1, %v174_v5 }
  0x52   : > { %p572_p13 = por %p571_p2, %p570_p10 }
  0x54   : > { %p573_p0 = pnand %p572_p13, %p566_p7 }
 0x111   : > { %v249_v8 = vpop.f32.mrf.mxu0 }
 0x112   : > { %v256_v9 = vsel %vm255_vm2, %v249_v8, -inf }
 0x113   : > { %257 = vmax.xlane.f32.xlu0 %v256_v9  ;;  %v441_v10 = vpop.f32.mrf.mxu0 }
 0x19c   : > { %v258_v11 = vpop.xlane.xlu0 %257 }
 0x19d   : > { %vm259_vm3 = vcmp.eq.f32.partialorder %v256_v9, %v258_v11  ;;  %v295_v34 = vsub.f32 %v258_v11, %v258_v11 }
 0x19e   : > { %v260_v12 = vsel %vm259_vm3, %v776_v7, 128 }
 0x19f   : > { %v262_v13 = vshra.s32 %v260_v12, 16  ;;  %v261_v15 = vand.u32 65535, %v260_v12  ;;  %v296_v36 = vmul.f32 1.442695, %v295_v34 }
 0x1a1   : > { %v264_v14 = vcvt.s32.f32 %v262_v13  ;;  %v263_v17 = vcvt.s32.f32 %v261_v15 }
 0x1a3   : > { %265 = vmin.xlane.f32.xlu0 %v264_v14 }
 0x22c   : > { %v266_v16 = vpop.xlane.xlu0 %265 }
 0x22d   : > { %vm267_vm4 = vcmp.eq.f32.partialorder %v264_v14, %v266_v16  ;;  %v272_v19 = vcvt.f32.s32 %v266_v16 }
 0x22e   : > { %v268_v18 = vsel %vm267_vm4, %v263_v17, inf }
 0x22f   : > { %269 = vmin.xlane.f32.xlu1 %v268_v18  ;;  %v273_v21 = vshll.u32 %v272_v19, 16 }
 0x2b8   : > { %v270_v20 = vpop.xlane.xlu1 %269 }
 0x2b9   : > { %v271_v22 = vcvt.f32.s32 %v270_v20 }
 0x2bb   : > { %v274_v23 = vadd.s32 %v273_v21, %v271_v22 }
 0x2bd   : > { %vm275_vm5 = vcmp.eq.s32.totalorder %v776_v7, %v274_v23  ;;  %v308_v46 = vcvt.s32.f32 %v274_v23 }
 0x2be   : > { %v276_v24 = vsel %vm275_vm5, -inf, %v256_v9 }
 0x2bf   : > { %277 = vmax.xlane.f32.xlu1 %v276_v24 }
 0x348   : > { %v278_v25 = vpop.xlane.xlu1 %277 }
 0x349   : > { %vm279_vm6 = vcmp.eq.f32.partialorder %v276_v24, %v278_v25  ;;  %v298_v33 = vsub.f32 %v278_v25, %v258_v11 }
 0x34a   : > { %v280_v26 = vsel %vm279_vm6, %v776_v7, 128 }
 0x34b   : > { %v282_v27 = vshra.s32 %v280_v26, 16  ;;  %v281_v29 = vand.u32 65535, %v280_v26  ;;  %v299_v35 = vmul.f32 1.442695, %v298_v33 }
 0x34d   : > { %v284_v28 = vcvt.s32.f32 %v282_v27  ;;  %v283_v31 = vcvt.s32.f32 %v281_v29  ;;  %503 = vpow2.f32 %v299_v35 }
 0x34e   : > { %505 = vpow2.f32 %v296_v36 }
 0x34f   : > { %285 = vmin.xlane.f32.xlu0 %v284_v28 }
 0x35a   : > { %v504_v37 = vpop.eup %503 }
 0x35b   : > { %v506_v38 = vpop.eup %505 }
 0x35c   : > { %v301_v39 = vadd.f32 %v506_v38, %v504_v37 }
 0x35e   : > { %v302_v40 = vadd.f32 1e-20, %v301_v39 }
 0x360   : > { %507 = vrcp.f32 %v302_v40 }
 0x36d   : > { %v508_v41 = vpop.eup %507 }
 0x36e   : > { %v305_v42 = vmul.f32 %v508_v41, %v506_v38  ;;  %v311_v51 = vmul.f32 %v508_v41, %v504_v37 }
 0x370   : > { %v306_v44 = vsel %vm304_vm8, %v305_v42, 0.0 }
 0x371   : > { %v309_v49 = vsel %vm307_vm9, %v308_v46, %v306_v44 }
 0x372   : > { %v312_v53 = vsel %vm310_vm10, %v311_v51, %v309_v49 }
 0x3d8   : > { %v286_v30 = vpop.xlane.xlu0 %285 }
 0x3d9   : > { %vm287_vm7 = vcmp.eq.f32.partialorder %v284_v28, %v286_v30  ;;  %v292_v43 = vcvt.f32.s32 %v286_v30 }
 0x3da   : > { %v288_v32 = vsel %vm287_vm7, %v283_v31, inf }
 0x3db   : > { %289 = vmin.xlane.f32.xlu1 %v288_v32  ;;  %v293_v47 = vshll.u32 %v292_v43, 16 }
 0x464   : > { %v290_v45 = vpop.xlane.xlu1 %289 }
 0x465   : > { %v291_v48 = vcvt.f32.s32 %v290_v45 }
 0x467   : > { %v294_v50 = vadd.s32 %v293_v47, %v291_v48 }
 0x469   : > { %v314_v52 = vcvt.s32.f32 %v294_v50 }
 0x46b   : > { %v315_v54 = vsel %vm313_vm11, %v314_v52, %v312_v53 }
 0x46c   : > { %316 = vst [vmem:[%s173_s17] sm:$0xff] %v315_v54 }
 0x46d   : > { %576 = shalt.err (!%p573_p0)
}
 0x46e   : > { %s577_s27 = scalar_lea.hbm %s792_s20, 128  ;;  %s581_s4 = scalar_lea.hbm %s831_s2, 256 }
 0x46f   : > { %p578_p5 = scmp.ne.s32.totalorder %s792_s20, %s577_s27  ;;  %p582_p1 = scmp.lt.s32.totalorder %s792_s20, %s831_s2 }
 0x470   : > { %p583_p4 = scmp.lt.s32.totalorder %s581_s4, %s577_s27 }
 0x471   : > { %p579_p9 = pnand %p578_p5, %p847_p3 }
 0x472   : > { %p584_p6 = por %p583_p4, %p582_p1 }
 0x473   : > { %p580_p12 = pneg %p579_p9 }
 0x475   : > { %p585_p8 = pnand %p584_p6, %p580_p12 }
 0x477   : > { %588 = shalt.err (!%p585_p8)
}
 0x478   : > { %448 = dma.vmem_to_hbm [thread:$0]  (%p847_p3), %s332_s8, 128, %s792_s20, %s318_s23  }
 0x479 PF: > { %s343_s7 = sand.u32 1, %s619_s9   ;;  %p848_p11 = scmp.ne.s32.totalorder %s837_s16, 0 }
 0x47a   : > { %p849_p7 = scmp.ge.s32.totalorder %s631_s12, 2  ;;  %s344_s14 = scalar_lea.sflag [#allocation4], %s343_s7 }
 0x47c   : > { %p459_p10 = pnand %p849_p7, %p848_p11 }
 0x47e   : > { %p460_p2 = pneg %p459_p10 }
 0x480   : > { %614 = dma.done.wait (%p460_p2), %s344_s14, 128  }
 0x481   : > { %616 = vsyncadd (%p460_p2), %s344_s14, 4294967168  ;;  %p16_p13 = scmp.ge.s32.totalorder %s709_s21, 4   ;;  %s850_s9 = smov %s623_s10 }
 0x482   : > { %s851_s10 = smov %s627_s11  ;;  %s852_s11 = smov %s726_s29 }
 0x483   : > { %s853_s12 = smov %s709_s21  ;;  %18 = sbr.rel (!%p16_p13) target bundleno = 6 (0x6), region = 77 }
 0x488   :  { %349 = vsyncpa [#allocation3], 1 }
 0x489   :  { %351 = vsyncpa [#allocation3 + $0x1], 1 }
 0x48a   :  { %352 = vsyncpa [#allocation6], 1 }
 0x48b   :  { %353 = vsyncpa [#allocation4], 1 }
 0x48c   :  { %355 = vsyncpa [#allocation4 + $0x1], 1 }

// kernel: tpu_custom_call.1
= control target key start
LH: loop header
LB: loop body
LE: loop exit
PB: predicated region body
PF: predicated region fallthrough
CT: control target
= control target key end

     0   :  { %7 = vsyncpa [#allocation3], 0  ;;  %s829_s0 = inlined_call_operand.hbm [shape: f32[16,32], index: 0, kind: input, shape index: {}]   ;;  %s830_s1 = inlined_call_operand.hbm [shape: f32[32,128], index: 1, kind: input, shape index: {}]   ;;  %s831_s2 = inlined_call_operand.hbm [shape: f32[16,128], index: 2, kind: output, shape index: {}]  }
   0x1   :  { %9 = vsyncpa [#allocation3 + $0x1], 0 }
   0x2   :  { %10 = vsyncpa [#allocation6], 0 }
   0x3   :  { %11 = vsyncpa [#allocation4], 0 }
   0x4   :  { %13 = vsyncpa [#allocation4 + $0x1], 0  ;;  %s655_s9 = smov 0   ;;  %s657_s10 = smov 0  }
   0x5   :  { %s659_s11 = smov 0   ;;  %s661_s12 = smov 0  }
   0x6 LB: > { %s676_s13 = sadd.s32 4294967295, %s631_s12   ;;  %s411_s14 = sadd.s32 4294967294, %s631_s12   ;;  %s631_s12 = sphi %s661_s12, %s853_s12   ;;  %s627_s11 = sphi %s659_s11, %s852_s11   ;;  %s623_s10 = sphi %s657_s10, %s851_s10   ;;  %s619_s9 = sphi %s655_s9, %s850_s9  }
   0x7   : > { %p39_p0 = scmp.ne.s32.totalorder %s623_s10, %s619_s9  ;;  %p832_p1 = scmp.eq.s32.totalorder %s676_s13, 0 }
   0x8   : > { %p90_p3 = scmp.eq.s32.totalorder %s411_s14, 1  ;;  %p412_p5 = scmp.ge.s32.totalorder %s631_s12, 1 }
   0x9   : > { %p685_p4 = por %p832_p1, %p39_p0  ;;  %p97_p7 = scmp.lt.s32.totalorder %s631_s12, 3 }
   0xa   : > { %p690_p6 = por %p90_p3, %p39_p0  ;;  %s633_s18 = smov [#allocation5]  }
   0xb   : > { %s836_s15 = scalar_select %p685_p4, 1, 0 }
   0xc   : > { %s837_s16 = scalar_select %p690_p6, 1, 0 }
   0xd   : > { %p695_p8 = pnand %p412_p5, %p97_p7  ;;  %s109_s19 = sshll.u32 %s633_s18, 4  ;;  %s110_s19 = int_to_ptr.vmem [resolvable:$true] %s109_s19 }
   0xe   : > { %s709_s21 = sadd.s32 1, %s631_s12   ;;  %s26_s22 = sadd.s32 1, %s627_s11 }
   0xf   : > { %s838_s17 = scalar_select %p695_p8, 1, 0 }
  0x10   : > { %p450_p9 = pneg %p695_p8  ;;  %s23_s23 = ssub.s32 %s631_s12, %s709_s21 }
  0x11   : > { %s520_s24 = scalar_lea.vmem %s110_s19, 512  ;;  %p528_p5 = scmp.lt.s32.totalorder %s110_s19, %s110_s19 }
  0x12   : > { %p704_p11 = pnand %p450_p9, %p832_p1  ;;  %p521_p13 = scmp.ne.s32.totalorder %s110_s19, %s520_s24 }
  0x13   : > { %p529_p7 = scmp.lt.s32.totalorder %s520_s24, %s520_s24 }
  0x14   : > { %p511_p12 = pneg %p704_p11 }
  0x15   : > { %p530_p10 = por %p529_p7, %p528_p5 }
  0x16   : > { %p523_p0 = pnand %p521_p13, %p511_p12 }
  0x18   : > { %p524_p3 = pneg %p523_p0 }
  0x1a   : > { %p531_p2 = pnand %p530_p10, %p524_p3 }
  0x1c   : > { %534 = shalt.err (!%p531_p2)
}
  0x1d   : > { %s634_s25 = smov 128   ;;  %s635_s26 = smov 8  }
  0x1e   : > { %453 = dma.hbm_to_vmem [thread:$0]  (!%p704_p11), %s830_s1, 512, %s110_s19, [#allocation6], %s634_s25, %s634_s25, %s635_s26  }
  0x1f   : > { %p24_p9 = scmp.eq.s32.totalorder %s23_s23, 0  ;;  %p33_p12 = scmp.ne.s32.totalorder %s627_s11, %s623_s10 }
  0x20   : > { %p34_p10 = scmp.eq.s32.totalorder %s631_s12, 0  ;;  %p463_p2 = scmp.lt.s32.totalorder %s631_s12, 2 }
  0x21   : > { %s726_s29 = scalar_select %p24_p9, %s627_s11, %s26_s22  }
  0x22   : > { %p35_p13 = por %p34_p10, %p33_p12  ;;  %p840_p0 = scmp.eq.s32.totalorder %s676_s13, 1 }
  0x23   : > { %s123_s3 = sand.u32 1, %s627_s11   ;;  %s416_s4 = sshll.u32 %s631_s12, 7 }
  0x24   : > { %p730_p3 = por %p840_p0, %p33_p12  ;;  %s415_s5 = sshll.u32 %s123_s3, 3 }
  0x25   : > { %s739_s8 = scalar_lea.hbm %s829_s0, %s416_s4  ;;  %s127_s14 = scalar_lea.vmem [#allocation2], %s415_s5 }
  0x26   : > { %s841_s30 = scalar_select %p730_p3, 1, 0 }
  0x27   : > { %s134_s18 = sshll.u32 %s127_s14, 4  ;;  %p741_p11 = pnand %p463_p2, %p35_p13  ;;  %s135_s18 = int_to_ptr.vmem [resolvable:$true] %s134_s18 }
  0x28   : > { %s124_s20 = scalar_lea.sflag [#allocation3], %s123_s3  ;;  %s535_s22 = scalar_lea.hbm %s739_s8, 128 }
  0x29   : > { %p536_p5 = scmp.ne.s32.totalorder %s739_s8, %s535_s22  ;;  %p537_p7 = pneg %p741_p11 }
  0x2a   : > { %s540_s25 = scalar_lea.hbm %s829_s0, 256  ;;  %p541_p10 = scmp.lt.s32.totalorder %s739_s8, %s829_s0 }
  0x2b   : > { %p538_p9 = pnand %p537_p7, %p536_p5  ;;  %p542_p2 = scmp.lt.s32.totalorder %s540_s25, %s535_s22 }
  0x2d   : > { %p539_p12 = pneg %p538_p9  ;;  %p543_p13 = por %p542_p2, %p541_p10 }
  0x2f   : > { %p544_p0 = pnand %p543_p13, %p539_p12 }
  0x31   : > { %547 = shalt.err (!%p544_p0)
}
  0x32   : > { %s548_s28 = scalar_lea.vmem %s135_s18, 128  ;;  %s636_s3 = smov [#allocation2]  }
  0x33   : > { %p549_p1 = scmp.ne.s32.totalorder %s135_s18, %s548_s28  ;;  %s553_s4 = sshll.u32 %s636_s3, 4  ;;  %s554_s4 = int_to_ptr.vmem [resolvable:$false] %s553_s4 }
  0x34   : > { %s555_s5 = scalar_lea.vmem %s554_s4, 256  ;;  %p556_p5 = scmp.lt.s32.totalorder %s135_s18, %s554_s4 }
  0x35   : > { %p551_p6 = pnand %p549_p1, %p537_p7  ;;  %p557_p9 = scmp.lt.s32.totalorder %s555_s5, %s548_s28 }
  0x37   : > { %p552_p3 = pneg %p551_p6  ;;  %p558_p4 = por %p557_p9, %p556_p5 }
  0x39   : > { %p559_p8 = pnand %p558_p4, %p552_p3 }
  0x3b   : > { %562 = shalt.err (!%p559_p8)
}
  0x3c   : > { %457 = dma.hbm_to_vmem [thread:$0]  (!%p741_p11), %s739_s8, 128, %s135_s18, %s124_s20  }
  0x3d   : > { %p843_p12 = scmp.ne.s32.totalorder %s838_s17, 0 }
  0x3e   : > { %s762_s6 = sand.u32 (!%p843_p12), 1, %s623_s10   ;;  %p844_p1 = scmp.ne.s32.totalorder (!%p843_p12), %s836_s15, 0 }
  0x3f   : > { %143 = sbr.rel (%p843_p12) target bundleno = 1145 (0x479), region = 28  ;;  %s418_s7 = sshll.u32 (!%p843_p12), %s762_s6, 3 }
  0x40   : > { %s146_s14 = scalar_lea.sflag (!%p843_p12), [#allocation3], %s762_s6  ;;  %s149_s22 = scalar_lea.vmem (!%p843_p12), [#allocation2], %s418_s7 }
  0x44   : > { %606 = dma.done.wait (%p844_p1), %s146_s14, 128  }
  0x45   : > { %608 = vsyncadd (%p844_p1), %s146_s14, 4294967168  ;;  %p845_p4 = scmp.eq.s32.totalorder %s676_s13, 0 }
  0x47   : > { %610 = dma.done.wait (%p845_p4), [#allocation6], 512   ;;  %p846_p6 = pmov %p845_p4 }
  0x48   : > { %v637_v0 = vmov 0.0   ;;  %vm638_vm0 = vmmov 0   ;;  %v178_v1 = vld [vmem:[#allocation5 + $0x18] sm:$0xff]  ;;  %v177_v2 = vld [vmem:[#allocation5 + $0x10] sm:$0xff]  ;;  %v176_v3 = vld [vmem:[#allocation5 + $0x8] sm:$0xff]  ;;  %vm179_vm1 = vcmask 261120   ;;  %v253_v6 = vlaneseq }
  0x49   : > { %612 = vsyncadd (%p846_p6), [#allocation6], 4294966784  ;;  %431 = vmatprep.subr.mxu0 %v637_v0  ;;  %439 = vmatprep.mubr.msk.f32.mxu0 %vm638_vm0, %v637_v0  ;;  %v175_v4 = vld [vmem:[#allocation5] sm:$0xff]  ;;  %v174_v5 = vld [vmem:[%s149_s22] sm:$0xff]  ;;  %s423_s15 = sshll.u32 %s676_s13, 7  ;;  %s173_s17 = scalar_lea.vmem [#allocation7], %s418_s7 }
  0x4a   : > { %432 = vmatpush3.msra.mxu0 %v178_v1  ;;  %v776_v7 = vand.u32 127, %v253_v6  ;;  %s331_s8 = sshll.u32 %s173_s17, 4  ;;  %s792_s20 = scalar_lea.hbm %s831_s2, %s423_s15  ;;  %s332_s8 = int_to_ptr.vmem [resolvable:$true] %s331_s8 }
  0x4b   : > { %433 = vmatprep.subr.mxu0 %v637_v0  ;;  %s318_s23 = scalar_lea.sflag [#allocation4], %s762_s6  ;;  %s563_s24 = scalar_lea.vmem %s332_s8, 128 }
  0x4c   : > { %434 = vmatpush3.msra.mxu0 %v177_v2  ;;  %vm255_vm2 = vcmp.lt.s32.totalorder %v776_v7, 4  ;;  %vm304_vm8 = vcmp.eq.s32.totalorder %v776_v7, 0  ;;  %vm307_vm9 = vcmp.eq.s32.totalorder %v776_v7, 2  ;;  %vm310_vm10 = vcmp.eq.s32.totalorder %v776_v7, 1  ;;  %p564_p8 = scmp.ne.s32.totalorder %s332_s8, %s563_s24  ;;  %p847_p3 = scmp.ne.s32.totalorder %s841_s30, 0 }
  0x4d   : > { %435 = vmatprep.subr.mxu0 %v637_v0  ;;  %vm313_vm11 = vcmp.eq.s32.totalorder %v776_v7, 3  ;;  %s639_s13 = smov [#allocation7]  }
  0x4e   : > { %436 = vmatpush3.msra.mxu0 %v176_v3  ;;  %p565_p11 = pnand %p564_p8, %p847_p3  ;;  %s567_s25 = sshll.u32 %s639_s13, 4  ;;  %s568_s25 = int_to_ptr.vmem [resolvable:$false] %s567_s25 }
  0x4f   : > { %437 = vmatprep.subr.mxu0 %v637_v0  ;;  %s569_s26 = scalar_lea.vmem %s568_s25, 256  ;;  %p570_p10 = scmp.lt.s32.totalorder %s332_s8, %s568_s25 }
  0x50   : > { %438 = vmatpush3.msra.mxu0 %v175_v4  ;;  %p566_p7 = pneg %p565_p11  ;;  %p571_p2 = scmp.lt.s32.totalorder %s569_s26, %s563_s24 }
  0x51   : > { %440 = vmatmul.mubr.msk.f32.vlgmr.msra.gmra.mxu0 %vm179_vm1, %v174_v5 }
  0x52   : > { %p572_p13 = por %p571_p2, %p570_p10 }
  0x54   : > { %p573_p0 = pnand %p572_p13, %p566_p7 }
 0x111   : > { %v249_v8 = vpop.f32.mrf.mxu0 }
 0x112   : > { %v256_v9 = vsel %vm255_vm2, %v249_v8, -inf }
 0x113   : > { %257 = vmax.xlane.f32.xlu0 %v256_v9  ;;  %v441_v10 = vpop.f32.mrf.mxu0 }
 0x19c   : > { %v258_v11 = vpop.xlane.xlu0 %257 }
 0x19d   : > { %vm259_vm3 = vcmp.eq.f32.partialorder %v256_v9, %v258_v11  ;;  %v295_v34 = vsub.f32 %v258_v11, %v258_v11 }
 0x19e   : > { %v260_v12 = vsel %vm259_vm3, %v776_v7, 128 }
 0x19f   : > { %v262_v13 = vshra.s32 %v260_v12, 16  ;;  %v261_v15 = vand.u32 65535, %v260_v12  ;;  %v296_v36 = vmul.f32 1.442695, %v295_v34 }
 0x1a1   : > { %v264_v14 = vcvt.s32.f32 %v262_v13  ;;  %v263_v17 = vcvt.s32.f32 %v261_v15 }
 0x1a3   : > { %265 = vmin.xlane.f32.xlu0 %v264_v14 }
 0x22c   : > { %v266_v16 = vpop.xlane.xlu0 %265 }
 0x22d   : > { %vm267_vm4 = vcmp.eq.f32.partialorder %v264_v14, %v266_v16  ;;  %v272_v19 = vcvt.f32.s32 %v266_v16 }
 0x22e   : > { %v268_v18 = vsel %vm267_vm4, %v263_v17, inf }
 0x22f   : > { %269 = vmin.xlane.f32.xlu1 %v268_v18  ;;  %v273_v21 = vshll.u32 %v272_v19, 16 }
 0x2b8   : > { %v270_v20 = vpop.xlane.xlu1 %269 }
 0x2b9   : > { %v271_v22 = vcvt.f32.s32 %v270_v20 }
 0x2bb   : > { %v274_v23 = vadd.s32 %v273_v21, %v271_v22 }
 0x2bd   : > { %vm275_vm5 = vcmp.eq.s32.totalorder %v776_v7, %v274_v23  ;;  %v308_v46 = vcvt.s32.f32 %v274_v23 }
 0x2be   : > { %v276_v24 = vsel %vm275_vm5, -inf, %v256_v9 }
 0x2bf   : > { %277 = vmax.xlane.f32.xlu1 %v276_v24 }
 0x348   : > { %v278_v25 = vpop.xlane.xlu1 %277 }
 0x349   : > { %vm279_vm6 = vcmp.eq.f32.partialorder %v276_v24, %v278_v25  ;;  %v298_v33 = vsub.f32 %v278_v25, %v258_v11 }
 0x34a   : > { %v280_v26 = vsel %vm279_vm6, %v776_v7, 128 }
 0x34b   : > { %v282_v27 = vshra.s32 %v280_v26, 16  ;;  %v281_v29 = vand.u32 65535, %v280_v26  ;;  %v299_v35 = vmul.f32 1.442695, %v298_v33 }
 0x34d   : > { %v284_v28 = vcvt.s32.f32 %v282_v27  ;;  %v283_v31 = vcvt.s32.f32 %v281_v29  ;;  %503 = vpow2.f32 %v299_v35 }
 0x34e   : > { %505 = vpow2.f32 %v296_v36 }
 0x34f   : > { %285 = vmin.xlane.f32.xlu0 %v284_v28 }
 0x35a   : > { %v504_v37 = vpop.eup %503 }
 0x35b   : > { %v506_v38 = vpop.eup %505 }
 0x35c   : > { %v301_v39 = vadd.f32 %v506_v38, %v504_v37 }
 0x35e   : > { %v302_v40 = vadd.f32 1e-20, %v301_v39 }
 0x360   : > { %507 = vrcp.f32 %v302_v40 }
 0x36d   : > { %v508_v41 = vpop.eup %507 }
 0x36e   : > { %v305_v42 = vmul.f32 %v508_v41, %v506_v38  ;;  %v311_v51 = vmul.f32 %v508_v41, %v504_v37 }
 0x370   : > { %v306_v44 = vsel %vm304_vm8, %v305_v42, 0.0 }
 0x371   : > { %v309_v49 = vsel %vm307_vm9, %v308_v46, %v306_v44 }
 0x372   : > { %v312_v53 = vsel %vm310_vm10, %v311_v51, %v309_v49 }
 0x3d8   : > { %v286_v30 = vpop.xlane.xlu0 %285 }
 0x3d9   : > { %vm287_vm7 = vcmp.eq.f32.partialorder %v284_v28, %v286_v30  ;;  %v292_v43 = vcvt.f32.s32 %v286_v30 }
 0x3da   : > { %v288_v32 = vsel %vm287_vm7, %v283_v31, inf }
 0x3db   : > { %289 = vmin.xlane.f32.xlu1 %v288_v32  ;;  %v293_v47 = vshll.u32 %v292_v43, 16 }
 0x464   : > { %v290_v45 = vpop.xlane.xlu1 %289 }
 0x465   : > { %v291_v48 = vcvt.f32.s32 %v290_v45 }
 0x467   : > { %v294_v50 = vadd.s32 %v293_v47, %v291_v48 }
 0x469   : > { %v314_v52 = vcvt.s32.f32 %v294_v50 }
 0x46b   : > { %v315_v54 = vsel %vm313_vm11, %v314_v52, %v312_v53 }
 0x46c   : > { %316 = vst [vmem:[%s173_s17] sm:$0xff] %v315_v54 }
 0x46d   : > { %576 = shalt.err (!%p573_p0)
}
 0x46e   : > { %s577_s27 = scalar_lea.hbm %s792_s20, 128  ;;  %s581_s4 = scalar_lea.hbm %s831_s2, 256 }
 0x46f   : > { %p578_p5 = scmp.ne.s32.totalorder %s792_s20, %s577_s27  ;;  %p582_p1 = scmp.lt.s32.totalorder %s792_s20, %s831_s2 }
 0x470   : > { %p583_p4 = scmp.lt.s32.totalorder %s581_s4, %s577_s27 }
 0x471   : > { %p579_p9 = pnand %p578_p5, %p847_p3 }
 0x472   : > { %p584_p6 = por %p583_p4, %p582_p1 }
 0x473   : > { %p580_p12 = pneg %p579_p9 }
 0x475   : > { %p585_p8 = pnand %p584_p6, %p580_p12 }
 0x477   : > { %588 = shalt.err (!%p585_p8)
}
 0x478   : > { %448 = dma.vmem_to_hbm [thread:$0]  (%p847_p3), %s332_s8, 128, %s792_s20, %s318_s23  }
 0x479 PF: > { %s343_s7 = sand.u32 1, %s619_s9   ;;  %p848_p11 = scmp.ne.s32.totalorder %s837_s16, 0 }
 0x47a   : > { %p849_p7 = scmp.ge.s32.totalorder %s631_s12, 2  ;;  %s344_s14 = scalar_lea.sflag [#allocation4], %s343_s7 }
 0x47c   : > { %p459_p10 = pnand %p849_p7, %p848_p11 }
 0x47e   : > { %p460_p2 = pneg %p459_p10 }
 0x480   : > { %614 = dma.done.wait (%p460_p2), %s344_s14, 128  }
 0x481   : > { %616 = vsyncadd (%p460_p2), %s344_s14, 4294967168  ;;  %p16_p13 = scmp.ge.s32.totalorder %s709_s21, 4   ;;  %s850_s9 = smov %s623_s10 }
 0x482   : > { %s851_s10 = smov %s627_s11  ;;  %s852_s11 = smov %s726_s29 }
 0x483   : > { %s853_s12 = smov %s709_s21  ;;  %18 = sbr.rel (!%p16_p13) target bundleno = 6 (0x6), region = 77 }
 0x488   :  { %349 = vsyncpa [#allocation3], 1 }
 0x489   :  { %351 = vsyncpa [#allocation3 + $0x1], 1 }
 0x48a   :  { %352 = vsyncpa [#allocation6], 1 }
 0x48b   :  { %353 = vsyncpa [#allocation4], 1 }
 0x48c   :  { %355 = vsyncpa [#allocation4 + $0x1], 1 }

</bundles_post_ra>
